<compile_context>
chip_gen: v5e
topology: v5e:2x2
jax: 0.10.0
libtpu: 0.0.40
codegen_flags: <defaults>
</compile_context>

<pallas_src>
import jax
import jax.numpy as jnp
from jax.experimental import pallas as pl
from jax.experimental.pallas import tpu as pltpu


def _round_up(x, m):
    return ((x + m - 1) // m) * m


def mlp_kernel(x_ref, w1_ref, b1_ref, w2_ref, b2_ref, w3_ref, b3_ref, o_ref):
    """Fused 3-layer MLP on one batch tile.

    x arrives in f32 and is cast to the (bf16) weight dtype here on the VPU.
    All accumulation / bias adds / ReLU stay in f32 (v5e-safe); activations
    are cast to bf16 only right at the next dot's input.
    """
    x = x_ref[...].astype(w1_ref.dtype)

    h = jnp.dot(x, w1_ref[...], preferred_element_type=jnp.float32)
    h = jnp.maximum(h + b1_ref[...], 0.0)

    h = jnp.dot(h.astype(w2_ref.dtype), w2_ref[...],
                preferred_element_type=jnp.float32)
    h = jnp.maximum(h + b2_ref[...], 0.0)

    out = jnp.dot(h.astype(w3_ref.dtype), w3_ref[...],
                  preferred_element_type=jnp.float32) + b3_ref[...]

    # Matmul ran lane-dense (N = padded 128); write back only the real
    # D_out columns so the HBM writeback is not 8-16x oversized.
    o_ref[...] = out[:, : o_ref.shape[1]].astype(o_ref.dtype)


def prepare_params(params, compute_dtype=jnp.bfloat16):
    """One-time (hoisted) pad-to-128-lanes + bf16 cast of weights.

    params: w1,b1,w2,b2,w3,b3 with weights stored as [in, out].
    Pad columns/rows are exact zeros, so they propagate zeros through ReLU
    and are never read back (output is stored at the true D_out width).
    """
    D_in, h1 = params["w1"].shape
    h2 = params["w2"].shape[1]
    D_out = params["w3"].shape[1]
    H1, H2, DO = _round_up(h1, 128), _round_up(h2, 128), _round_up(D_out, 128)
    f32 = jnp.float32

    w1 = jnp.zeros((D_in, H1), compute_dtype).at[:, :h1].set(
        params["w1"].astype(compute_dtype))
    w2 = jnp.zeros((H1, H2), compute_dtype).at[:h1, :h2].set(
        params["w2"].astype(compute_dtype))
    w3 = jnp.zeros((H2, DO), compute_dtype).at[:h2, :D_out].set(
        params["w3"].astype(compute_dtype))
    b1 = jnp.zeros((1, H1), f32).at[:, :h1].set(params["b1"].astype(f32)[None, :])
    b2 = jnp.zeros((1, H2), f32).at[:, :h2].set(params["b2"].astype(f32)[None, :])
    b3 = jnp.zeros((1, DO), f32).at[:, :D_out].set(params["b3"].astype(f32)[None, :])

    return {"w1": w1, "b1": b1, "w2": w2, "b2": b2, "w3": w3, "b3": b3,
            "dims": (D_in, h1, h2, D_out)}


def classifier_forward(x, prepared, *, tile_b=None):
    """x: [B, D_in] (any float dtype). prepared: output of prepare_params()."""
    B, D_in = x.shape
    D_in_p, _h1, _h2, D_out = prepared["dims"]
    assert D_in == D_in_p, "x feature dim does not match params"
    w1, b1 = prepared["w1"], prepared["b1"]
    w2, b2 = prepared["w2"], prepared["b2"]
    w3, b3 = prepared["w3"], prepared["b3"]
    H1, H2, DO = w1.shape[1], w2.shape[1], w3.shape[1]

    out_dtype = x.dtype
    xbytes = jnp.dtype(x.dtype).itemsize
    wbytes = jnp.dtype(w1.dtype).itemsize
    obytes = jnp.dtype(out_dtype).itemsize

    # ---- batch tiling -------------------------------------------------------
    # Big tiles amortize the ~0.35us/step pipeline overhead; rounded to 16 for
    # bf16 sublane packing. Cap so the grid keeps >=4 steps on large batches
    # (v7x: two TensorCores split the "parallel" axis; also double-buffers the
    # x / out DMAs).
    Bp_min = _round_up(B, 16)
    if tile_b is None:
        tile_b = 2048
    tile_b = max(16, _round_up(int(tile_b), 16))
    tile_b = min(tile_b, Bp_min)
    if Bp_min >= 4 * 16:
        tile_b = min(tile_b, max(16, _round_up(-(-Bp_min // 4), 16)))
    Bp = _round_up(B, tile_b)
    grid = (Bp // tile_b,)

    xp = x if Bp == B else jnp.pad(x, ((0, Bp - B), (0, 0)))  # zero rows, sliced off

    # ---- device-aware VMEM budget ------------------------------------------
    vmem_bytes = (
        2 * tile_b * D_in * xbytes                      # double-buffered x tile (f32)
        + 2 * tile_b * D_out * obytes                   # double-buffered out tile
        + 2 * (D_in * H1 + H1 * H2 + H2 * DO) * wbytes  # resident weights (2 bufs, conservative)
        + 2 * 8 * (H1 + H2 + DO) * 4                    # biases (sublane-padded)
        + 2 * tile_b * max(H1, H2, DO) * (4 + wbytes)   # f32 acts + bf16 dot-input copies
    )
    try:
        vmem_cap = int(getattr(pltpu.get_tpu_info(), "vmem_capacity_bytes", 64 << 20))
    except Exception:  # pragma: no cover - conservative fallback
        vmem_cap = 64 << 20
    vmem_limit = int(max(16 << 20, min(vmem_bytes + (4 << 20), int(0.75 * vmem_cap))))

    # ---- cost estimate (helps XLA schedule surrounding ops) ----------------
    flops = 2 * Bp * (D_in * H1 + H1 * H2 + H2 * DO)
    bytes_accessed = (
        Bp * D_in * xbytes
        + (D_in * H1 + H1 * H2 + H2 * DO) * wbytes
        + (H1 + H2 + DO) * 4
        + Bp * D_out * obytes
    )

    out = pl.pallas_call(
        mlp_kernel,
        out_shape=jax.ShapeDtypeStruct((Bp, D_out), out_dtype),
        grid_spec=pltpu.PrefetchScalarGridSpec(
            num_scalar_prefetch=0,
            grid=grid,
            in_specs=[
                # batch-tiled activations (f32, cast in-kernel)
                pl.BlockSpec((tile_b, D_in), lambda i: (i, 0)),
                # weights / biases: constant block index -> fetched once
                pl.BlockSpec((D_in, H1), lambda i: (0, 0)),
                pl.BlockSpec((1, H1), lambda i: (0, 0)),
                pl.BlockSpec((H1, H2), lambda i: (0, 0)),
                pl.BlockSpec((1, H2), lambda i: (0, 0)),
                pl.BlockSpec((H2, DO), lambda i: (0, 0)),
                pl.BlockSpec((1, DO), lambda i: (0, 0)),
            ],
            # narrow (true-D_out) output block -> minimal HBM writeback
            out_specs=pl.BlockSpec((tile_b, D_out), lambda i: (i, 0)),
        ),
        compiler_params=pltpu.CompilerParams(
            dimension_semantics=("parallel",),
            vmem_limit_bytes=vmem_limit,
        ),
        cost_estimate=pl.CostEstimate(
            flops=flops, transcendentals=0, bytes_accessed=bytes_accessed),
    )(xp, w1, b1, w2, b2, w3, b3)

    return out[:B]


def init_params(key, D_in, h1, h2, D_out, dtype=jnp.float32):
    """Deterministic synthetic init (shapes match nn.Linear; weights as [in, out])."""
    ks = jax.random.split(key, 6)

    def lin(kw, kb, fan_in, fan_out):
        bound = 1.0 / jnp.sqrt(fan_in)
        w = jax.random.uniform(kw, (fan_in, fan_out), dtype, -bound, bound)
        b = jax.random.uniform(kb, (fan_out,), dtype, -bound, bound)
        return w, b

    w1, b1 = lin(ks[0], ks[1], D_in, h1)
    w2, b2 = lin(ks[2], ks[3], h1, h2)
    w3, b3 = lin(ks[4], ks[5], h2, D_out)
    return {"w1": w1, "b1": b1, "w2": w2, "b2": b2, "w3": w3, "b3": b3}


def reference_forward_bf16(x, p):
    """Mirrors the kernel numerics: bf16 dot inputs, f32 accumulate/bias/ReLU."""
    bf = jnp.bfloat16
    f32 = jnp.float32
    h = jnp.dot(x.astype(bf), p["w1"].astype(bf), preferred_element_type=f32)
    h = jnp.maximum(h + p["b1"].astype(f32), 0.0)
    h = jnp.dot(h.astype(bf), p["w2"].astype(bf), preferred_element_type=f32)
    h = jnp.maximum(h + p["b2"].astype(f32), 0.0)
    return jnp.dot(h.astype(bf), p["w3"].astype(bf), preferred_element_type=f32) \
        + p["b3"].astype(f32)


if __name__ == "__main__":
    # Small shapes consistent with Classifier(D_in=64, h1=32, h2=32, D_out=16).
    # NOTE: at this size wall time is pure pallas_call overhead; the tiling /
    # bf16 / narrow-writeback changes target realistic batch sizes (>= 4096).
    B, D_in, h1, h2, D_out = 8, 64, 32, 32, 16

    key = jax.random.PRNGKey(0)
    kx, kp = jax.random.split(key)
    x = jax.random.normal(kx, (B, D_in), dtype=jnp.float32)
    params = init_params(kp, D_in, h1, h2, D_out)
    prepared = prepare_params(params)          # one-time pad + bf16 cast (hoisted)

    out = jax.block_until_ready(classifier_forward(x, prepared))
    assert out.shape == (B, D_out)

    ref = reference_forward_bf16(x, params)
    assert jnp.allclose(out, ref, atol=2e-2, rtol=2e-2), "mismatch vs JAX reference"

    # Exercise the multi-tile + ragged-batch path (grid > 1, batch padding).
    B2 = 20
    x2 = jax.random.normal(jax.random.PRNGKey(1), (B2, D_in), dtype=jnp.float32)
    out2 = jax.block_until_ready(classifier_forward(x2, prepared, tile_b=16))
    ref2 = reference_forward_bf16(x2, params)
    assert out2.shape == (B2, D_out)
    assert jnp.allclose(out2, ref2, atol=2e-2, rtol=2e-2), "mismatch (tiled path)"

    print("KERNEL_OK")
</pallas_src>

<mosaic_0001>
module attributes {stable_mosaic.version = 11 : i64} {
  func.func @mlp_kernel(%arg0: i32, %arg1: memref<16x64xf32, #tpu.memory_space<vmem>>, %arg2: memref<64x128xbf16, #tpu.memory_space<vmem>>, %arg3: memref<1x128xf32, #tpu.memory_space<vmem>>, %arg4: memref<128x128xbf16, #tpu.memory_space<vmem>>, %arg5: memref<1x128xf32, #tpu.memory_space<vmem>>, %arg6: memref<128x128xbf16, #tpu.memory_space<vmem>>, %arg7: memref<1x128xf32, #tpu.memory_space<vmem>>, %arg8: memref<16x16xf32, #tpu.memory_space<vmem>>) attributes {dimension_semantics = [#tpu.dimension_semantics<parallel>], iteration_bounds = array<i64: 1>, scalar_prefetch = 0 : i64, scratch_operands = 0 : i64, tpu.core_type = #tpu.core_type<tc>, window_params = [{transform_indices = @transform_0, window_bounds = array<i64: 16, 64>}, {pipeline_mode = #tpu.pipeline_mode<synchronous>, transform_indices = @transform_1, window_bounds = array<i64: 64, 128>}, {pipeline_mode = #tpu.pipeline_mode<synchronous>, transform_indices = @transform_2, window_bounds = array<i64: 1, 128>}, {pipeline_mode = #tpu.pipeline_mode<synchronous>, transform_indices = @transform_3, window_bounds = array<i64: 128, 128>}, {pipeline_mode = #tpu.pipeline_mode<synchronous>, transform_indices = @transform_4, window_bounds = array<i64: 1, 128>}, {pipeline_mode = #tpu.pipeline_mode<synchronous>, transform_indices = @transform_5, window_bounds = array<i64: 128, 128>}, {pipeline_mode = #tpu.pipeline_mode<synchronous>, transform_indices = @transform_6, window_bounds = array<i64: 1, 128>}, {transform_indices = @transform_7, window_bounds = array<i64: 16, 16>}]} {
    %c0 = arith.constant 0 : index
    %c0_0 = arith.constant 0 : index
    %0 = vector.load %arg1[%c0, %c0_0] : memref<16x64xf32, #tpu.memory_space<vmem>>, vector<16x64xf32>
    %1 = arith.truncf %0 : vector<16x64xf32> to vector<16x64xbf16>
    %c0_1 = arith.constant 0 : index
    %c0_2 = arith.constant 0 : index
    %2 = vector.load %arg2[%c0_1, %c0_2] : memref<64x128xbf16, #tpu.memory_space<vmem>>, vector<64x128xbf16>
    %cst = arith.constant dense<0.000000e+00> : vector<16x128xf32>
    %3 = tpu.matmul %1, %2, %cst {dimension_numbers = #tpu.dot_dimension_numbers<[1], [0], [0], [1], [0, 0, 1, 1], [], []>} : vector<16x64xbf16>, vector<64x128xbf16>, vector<16x128xf32> -> vector<16x128xf32>
    %c0_3 = arith.constant 0 : index
    %c0_4 = arith.constant 0 : index
    %4 = vector.load %arg3[%c0_3, %c0_4] : memref<1x128xf32, #tpu.memory_space<vmem>>, vector<1x128xf32>
    %5 = vector.broadcast %4 : vector<1x128xf32> to vector<16x128xf32>
    %6 = arith.addf %3, %5 : vector<16x128xf32>
    %cst_5 = arith.constant 0.000000e+00 : f32
    %7 = vector.broadcast %cst_5 : f32 to vector<16x128xf32>
    %8 = arith.maximumf %6, %7 : vector<16x128xf32>
    %9 = arith.truncf %8 : vector<16x128xf32> to vector<16x128xbf16>
    %c0_6 = arith.constant 0 : index
    %c0_7 = arith.constant 0 : index
    %10 = vector.load %arg4[%c0_6, %c0_7] : memref<128x128xbf16, #tpu.memory_space<vmem>>, vector<128x128xbf16>
    %cst_8 = arith.constant dense<0.000000e+00> : vector<16x128xf32>
    %11 = tpu.matmul %9, %10, %cst_8 {dimension_numbers = #tpu.dot_dimension_numbers<[1], [0], [0], [1], [0, 0, 1, 1], [], []>} : vector<16x128xbf16>, vector<128x128xbf16>, vector<16x128xf32> -> vector<16x128xf32>
    %c0_9 = arith.constant 0 : index
    %c0_10 = arith.constant 0 : index
    %12 = vector.load %arg5[%c0_9, %c0_10] : memref<1x128xf32, #tpu.memory_space<vmem>>, vector<1x128xf32>
    %13 = vector.broadcast %12 : vector<1x128xf32> to vector<16x128xf32>
    %14 = arith.addf %11, %13 : vector<16x128xf32>
    %cst_11 = arith.constant 0.000000e+00 : f32
    %15 = vector.broadcast %cst_11 : f32 to vector<16x128xf32>
    %16 = arith.maximumf %14, %15 : vector<16x128xf32>
    %17 = arith.truncf %16 : vector<16x128xf32> to vector<16x128xbf16>
    %c0_12 = arith.constant 0 : index
    %c0_13 = arith.constant 0 : index
    %18 = vector.load %arg6[%c0_12, %c0_13] : memref<128x128xbf16, #tpu.memory_space<vmem>>, vector<128x128xbf16>
    %cst_14 = arith.constant dense<0.000000e+00> : vector<16x128xf32>
    %19 = tpu.matmul %17, %18, %cst_14 {dimension_numbers = #tpu.dot_dimension_numbers<[1], [0], [0], [1], [0, 0, 1, 1], [], []>} : vector<16x128xbf16>, vector<128x128xbf16>, vector<16x128xf32> -> vector<16x128xf32>
    %c0_15 = arith.constant 0 : index
    %c0_16 = arith.constant 0 : index
    %20 = vector.load %arg7[%c0_15, %c0_16] : memref<1x128xf32, #tpu.memory_space<vmem>>, vector<1x128xf32>
    %21 = vector.broadcast %20 : vector<1x128xf32> to vector<16x128xf32>
    %22 = arith.addf %19, %21 : vector<16x128xf32>
    %23 = vector.extract_strided_slice %22 {offsets = [0, 0], sizes = [16, 16], strides = [1, 1]} : vector<16x128xf32> to vector<16x16xf32>
    %c0_17 = arith.constant 0 : index
    %c0_18 = arith.constant 0 : index
    %24 = vector.load %arg8[%c0_17, %c0_18] : memref<16x16xf32, #tpu.memory_space<vmem>>, vector<16x16xf32>
    tpu.vector_store %arg8[%c0_17, %c0_18], %23 {strides = array<i32>} : memref<16x16xf32, #tpu.memory_space<vmem>>, vector<16x16xf32>,
    return
  }
  func.func @transform_0(%arg0: i32) -> (i32, i32) {
    %c0_i32 = arith.constant 0 : i32
    %c0_i32_0 = arith.constant 0 : i32
    return %arg0, %c0_i32 : i32, i32
  }
  func.func @transform_1(%arg0: i32) -> (i32, i32) {
    %c0_i32 = arith.constant 0 : i32
    %c0_i32_0 = arith.constant 0 : i32
    %c0_i32_1 = arith.constant 0 : i32
    return %c0_i32, %c0_i32_0 : i32, i32
  }
  func.func @transform_2(%arg0: i32) -> (i32, i32) {
    %c0_i32 = arith.constant 0 : i32
    %c0_i32_0 = arith.constant 0 : i32
    %c0_i32_1 = arith.constant 0 : i32
    return %c0_i32, %c0_i32_0 : i32, i32
  }
  func.func @transform_3(%arg0: i32) -> (i32, i32) {
    %c0_i32 = arith.constant 0 : i32
    %c0_i32_0 = arith.constant 0 : i32
    %c0_i32_1 = arith.constant 0 : i32
    return %c0_i32, %c0_i32_0 : i32, i32
  }
  func.func @transform_4(%arg0: i32) -> (i32, i32) {
    %c0_i32 = arith.constant 0 : i32
    %c0_i32_0 = arith.constant 0 : i32
    %c0_i32_1 = arith.constant 0 : i32
    return %c0_i32, %c0_i32_0 : i32, i32
  }
  func.func @transform_5(%arg0: i32) -> (i32, i32) {
    %c0_i32 = arith.constant 0 : i32
    %c0_i32_0 = arith.constant 0 : i32
    %c0_i32_1 = arith.constant 0 : i32
    return %c0_i32, %c0_i32_0 : i32, i32
  }
  func.func @transform_6(%arg0: i32) -> (i32, i32) {
    %c0_i32 = arith.constant 0 : i32
    %c0_i32_0 = arith.constant 0 : i32
    %c0_i32_1 = arith.constant 0 : i32
    return %c0_i32, %c0_i32_0 : i32, i32
  }
  func.func @transform_7(%arg0: i32) -> (i32, i32) {
    %c0_i32 = arith.constant 0 : i32
    %c0_i32_0 = arith.constant 0 : i32
    return %arg0, %c0_i32 : i32, i32
  }
}

</mosaic_0001>

<bundles_post_ra>
// kernel: tpu_custom_call.1
= control target key start
LH: loop header
LB: loop body
LE: loop exit
PB: predicated region body
PF: predicated region fallthrough
CT: control target
= control target key end

     0   :  { %12 = vsyncpa [#allocation3], 0  ;;  %s662_s0 = inlined_call_operand.hbm [shape: f32[16,64], index: 0, kind: input, shape index: {}]   ;;  %s663_s1 = inlined_call_operand.hbm [shape: bf16[64,128], index: 1, kind: input, shape index: {}]   ;;  %s664_s2 = inlined_call_operand.vmem [shape: f32[1,128], index: 2, kind: input, shape index: {}]   ;;  %s665_s3 = inlined_call_operand.hbm [shape: bf16[128,128], index: 3, kind: input, shape index: {}]   ;;  %s666_s4 = inlined_call_operand.vmem [shape: f32[1,128], index: 4, kind: input, shape index: {}]   ;;  %s667_s5 = inlined_call_operand.hbm [shape: bf16[128,128], index: 5, kind: input, shape index: {}]   ;;  %s668_s6 = inlined_call_operand.vmem [shape: f32[1,128], index: 6, kind: input, shape index: {}]   ;;  %s669_s7 = inlined_call_operand.hbm [shape: f32[16,16], index: 7, kind: output, shape index: {}]  }
   0x1   :  { %13 = vsyncpa [#allocation6], 0 }
   0x2   :  { %14 = vsyncpa [#allocation9], 0  ;;  %s33_s26 = sshll.u32 %s663_s1, 4  ;;  %s34_s26 = int_to_ptr.hbm [resolvable:$true] %s33_s26 }
   0x3   :  { %15 = vsyncpa [#allocation4], 0  ;;  %s583_s27 = smov [#allocation5]   ;;  %s20_s8 = sshll.u32 %s662_s0, 4  ;;  %s21_s8 = int_to_ptr.hbm [resolvable:$true] %s20_s8 }
   0x4   :  { %s35_s28 = sshll.u32 %s583_s27, 4  ;;  %s584_s9 = smov 64   ;;  %s36_s28 = int_to_ptr.vmem [resolvable:$true] %s35_s28 }
   0x5   :  { %s585_s10 = smov 4   ;;  %s586_s11 = smov [#allocation2]  }
   0x6   :  { %41 = dma.hbm_to_vmem [thread:$0]  %s34_s26, 512, %s36_s28, [#allocation6], %s584_s9, %s584_s9, %s585_s10  }
   0x7   :  { %s22_s12 = sshll.u32 %s586_s11, 4  ;;  %s587_s13 = smov 128   ;;  %s23_s12 = int_to_ptr.vmem [resolvable:$true] %s22_s12 }
   0x8   :  { %s588_s14 = smov 8   ;;  %s48_s16 = sshll.u32 %s665_s3, 4  ;;  %s49_s16 = int_to_ptr.hbm [resolvable:$true] %s48_s16 }
   0x9   :  { %28 = dma.hbm_to_vmem [thread:$0]  %s21_s8, 256, %s23_s12, [#allocation3], %s587_s13, %s587_s13, %s588_s14  }
   0xa   :  { %s589_s17 = smov [#allocation7]   ;;  %s63_s20 = sshll.u32 %s667_s5, 4  ;;  %s64_s20 = int_to_ptr.hbm [resolvable:$true] %s63_s20 }
   0xb   :  { %s50_s0 = sshll.u32 %s589_s17, 4  ;;  %s590_s21 = smov [#allocation8]   ;;  %s51_s0 = int_to_ptr.vmem [resolvable:$true] %s50_s0 }
   0xc   :  { %56 = dma.hbm_to_vmem [thread:$0]  %s49_s16, 1024, %s51_s0, [#allocation6], %s584_s9, %s584_s9, %s585_s10  }
   0xd   :  { %s65_s22 = sshll.u32 %s590_s21, 4  ;;  %s66_s22 = int_to_ptr.vmem [resolvable:$true] %s65_s22 }
   0xe   :  { %71 = dma.hbm_to_vmem [thread:$0]  %s64_s20, 1024, %s66_s22, [#allocation9], %s584_s9, %s584_s9, %s585_s10  }
   0xf   :  { %575 = dma.done.wait [#allocation3], 256  }
  0x10   :  { %576 = vsyncadd [#allocation3], 4294967040 }
  0x11   :  { %577 = dma.done.wait [#allocation6], 1536  }
  0x12   :  { %578 = vsyncadd [#allocation6], 4294965760 }
  0x13   :  { %579 = dma.done.wait [#allocation9], 1024  }
  0x14   :  { %580 = vsyncadd [#allocation9], 4294966272  ;;  %v426_v0 = vld [vmem:[#allocation5 + $0x18] sm:$0xff]  ;;  %v425_v1 = vld [vmem:[#allocation5 + $0x10] sm:$0xff]  ;;  %vm130_vm0 = vcmask 523264   ;;  %vm318_vm1 = vcmask 130048  }
  0x15   :  { %138 = vmatpush.bf16.msra.mxu0 %v426_v0  ;;  %v434_v2 = vld [vmem:[#allocation7 + $0x38] sm:$0xff]  ;;  %v433_v3 = vld [vmem:[#allocation7 + $0x30] sm:$0xff]  ;;  %v424_v4 = vld [vmem:[#allocation5 + $0x8] sm:$0xff]  ;;  %s591_s26 = smov [#allocation10]  }
  0x16   :  { %219 = vmatpush.bf16.msra.mxu1 %v434_v2  ;;  %v432_v5 = vld [vmem:[#allocation7 + $0x28] sm:$0xff]  ;;  %v423_v6 = vld [vmem:[#allocation5] sm:$0xff]  ;;  %v91_v7 = vld [vmem:[#allocation2] sm:$0xff]  ;;  %s325_s27 = sshll.u32 %s591_s26, 4  ;;  %s326_s27 = int_to_ptr.vmem [resolvable:$true] %s325_s27 }
  0x17   :  { %v92_v8 = vld [vmem:[#allocation2 + $0x8] sm:$0xff]  ;;  %v431_v9 = vld [vmem:[#allocation7 + $0x20] sm:$0xff]  ;;  %v429_v12 = vld [vmem:[#allocation7 + $0x10] sm:$0xff] }
  0x18   :  { %v93_v10 = vpack.c.bf16 %v92_v8, %v91_v7  ;;  %v430_v11 = vld [vmem:[#allocation7 + $0x18] sm:$0xff]  ;;  %v428_v13 = vld [vmem:[#allocation7 + $0x8] sm:$0xff]  ;;  %v427_v14 = vld [vmem:[#allocation7] sm:$0xff] }
  0x19   :  { %139 = vmatpush.bf16.msra.mxu0 %v425_v1  ;;  %v442_v15 = vld [vmem:[#allocation8 + $0x38] sm:$0xff]  ;;  %v441_v16 = vld [vmem:[#allocation8 + $0x30] sm:$0xff]  ;;  %v440_v17 = vld [vmem:[#allocation8 + $0x28] sm:$0xff] }
  0x1a   :  { %220 = vmatpush.bf16.msra.mxu1 %v433_v3  ;;  %304 = vmatpush.bf16.msra.mxu2 %v442_v15  ;;  %v439_v18 = vld [vmem:[#allocation8 + $0x20] sm:$0xff]  ;;  %v452_v20 = vld [vmem:[%s664_s2] ss:$0 sm:$0xff]  ;;  %v438_v27 = vld [vmem:[#allocation8 + $0x18] sm:$0xff] }
  0x1b   :  { %v437_v28 = vld [vmem:[#allocation8 + $0x10] sm:$0xff]  ;;  %v436_v29 = vld [vmem:[#allocation8 + $0x8] sm:$0xff]  ;;  %v435_v30 = vld [vmem:[#allocation8] sm:$0xff] }
  0x1c   :  { %v453_v32 = vld [vmem:[%s666_s4] ss:$0 sm:$0xff]  ;;  %s327_s4 = sshll.u32 %s669_s7, 4  ;;  %s328_s4 = int_to_ptr.hbm [resolvable:$true] %s327_s4 }
  0x1d   :  { %140 = vmatpush.bf16.msra.mxu0 %v424_v4  ;;  %v454_v39 = vld [vmem:[%s668_s6] ss:$0 sm:$0xff] }
  0x1e   :  { %221 = vmatpush.bf16.msra.mxu1 %v432_v5  ;;  %305 = vmatpush.bf16.msra.mxu2 %v441_v16 }
  0x21   :  { %141 = vmatpush.bf16.msra.mxu0 %v423_v6 }
  0x22   :  { %222 = vmatpush.bf16.msra.mxu1 %v431_v9  ;;  %306 = vmatpush.bf16.msra.mxu2 %v440_v17 }
  0x24   :  { %358 = vmatmul.msk.bf16.vlgmr.msra.gmra.mxu0 %vm130_vm0, %v93_v10 }
  0x26   :  { %223 = vmatpush.bf16.msra.mxu1 %v430_v11  ;;  %307 = vmatpush.bf16.msra.mxu2 %v439_v18 }
  0x2a   :  { %224 = vmatpush.bf16.msra.mxu1 %v429_v12  ;;  %308 = vmatpush.bf16.msra.mxu2 %v438_v27 }
  0x2e   :  { %225 = vmatpush.bf16.msra.mxu1 %v428_v13  ;;  %309 = vmatpush.bf16.msra.mxu2 %v437_v28 }
  0x32   :  { %226 = vmatpush.bf16.msra.mxu1 %v427_v14  ;;  %310 = vmatpush.bf16.msra.mxu2 %v436_v29 }
  0x36   :  { %311 = vmatpush.bf16.msra.mxu2 %v435_v30 }
  0xa1   :  { %v143_v19 = vpop.f32.mrf.mxu0 }
  0xa2   :  { %v144_v21 = vadd.f32 %v452_v20, %v143_v19 }
  0xa4   :  { %v148_v24 = vmax.f32 %v144_v21, 0.0 }
  0xa9   :  { %v145_v22 = vpop.f32.mrf.mxu0 }
  0xaa   :  { %v146_v23 = vadd.f32 %v452_v20, %v145_v22 }
  0xac   :  { %v149_v25 = vmax.f32 %v146_v23, 0.0 }
  0xae   :  { %v150_v26 = vpack.c.bf16 %v149_v25, %v148_v24 }
  0xb0   :  { %227 = vmatmul.bf16.vlgmr.msra.gmra.mxu1 %v150_v26 }
 0x12d   :  { %v228_v31 = vpop.f32.mrf.mxu1 }
 0x12e   :  { %v229_v33 = vadd.f32 %v453_v32, %v228_v31 }
 0x130   :  { %v233_v36 = vmax.f32 %v229_v33, 0.0 }
 0x135   :  { %v230_v34 = vpop.f32.mrf.mxu1 }
 0x136   :  { %v231_v35 = vadd.f32 %v453_v32, %v230_v34 }
 0x138   :  { %v234_v37 = vmax.f32 %v231_v35, 0.0 }
 0x13a   :  { %v235_v38 = vpack.c.bf16 %v234_v37, %v233_v36 }
 0x13c   :  { %312 = vmatmul.bf16.vlgmr.msra.gmra.mxu2 %v235_v38 }
 0x1bf   :  { %v313_v40 = vpop.f32.mrf.mxu2 }
 0x1c0   :  { %v314_v41 = vadd.f32 %v454_v39, %v313_v40 }
 0x1c2   :  { %319 = vst.msk [vmem:[#allocation10] sm:$0xff] %vm318_vm1, %v314_v41 }
 0x1c7   :  { %v315_v42 = vpop.f32.mrf.mxu2 }
 0x1c8   :  { %v316_v43 = vadd.f32 %v454_v39, %v315_v42 }
 0x1ca   :  { %320 = vst.msk [vmem:[#allocation10 + $0x8] sm:$0xff] %vm318_vm1, %v316_v43 }
 0x1cb   :  { %333 = dma.vmem_to_hbm [thread:$0]  %s326_s27, 256, %s328_s4, [#allocation4], %s587_s13, %s587_s13, %s588_s14  }
 0x1cc   :  { %581 = dma.done.wait [#allocation4], 256  }
 0x1cd   :  { %582 = vsyncadd [#allocation4], 4294967040 }
 0x1ce   :  { %338 = vsyncpa [#allocation3], 1 }
 0x1cf   :  { %339 = vsyncpa [#allocation6], 1 }
 0x1d0   :  { %340 = vsyncpa [#allocation9], 1 }
 0x1d1   :  { %341 = vsyncpa [#allocation4], 1 }

</bundles_post_ra>
